<compile_context>
chip_gen: v5e
topology: v5e:2x2
jax: 0.10.0
libtpu: 0.0.40
codegen_flags: <defaults>
</compile_context>

<pallas_src>
import jax
import jax.numpy as jnp
from jax.experimental import pallas as pl
from jax.experimental.pallas import tpu as pltpu

LANE = 128
SUBLANE = 8


def _round_up(n, m):
    return ((n + m - 1) // m) * m


# --------------------------------------------------------------------------- kernel
def residual_block_kernel(scalars_ref, x_ref, w1r_ref, w2_ref, bias_ref, o_ref):
    """scalars=(alpha,beta) in SMEM; x tile, fused W1|Wr, W2, packed biases in VMEM.

    bias_ref layout (lane-aligned halves): [ b1 | br | b2 ], each F_out_p wide.
    """
    alpha = scalars_ref[0]
    beta = jnp.clip(scalars_ref[1], 0.01, 1.0)
    one_m_beta = 1.0 - beta

    fo = w2_ref.shape[1]  # padded output width (multiple of 128)
    x = x_ref[...]

    # Fused fc1 + fc_residual matmul: one MXU pass produces [h1 | r].
    hr = jnp.dot(x, w1r_ref[...], preferred_element_type=jnp.float32)

    # fc1 adaptive activation (bias add + tanh on VPU/EUP, f32).
    h = jnp.tanh(alpha * (hr[:, :fo] + bias_ref[:, :fo]))

    # fc2 (cast activation to weight dtype so bf16 weights hit the fast MXU path;
    # accumulation stays f32).
    h2 = jnp.dot(h.astype(w2_ref.dtype), w2_ref[...],
                 preferred_element_type=jnp.float32)

    # Gated residual mix; fold the two tail biases into one broadcast add.
    r = hr[:, fo:]
    bias_mix = beta * bias_ref[:, 2 * fo:] + one_m_beta * bias_ref[:, fo:2 * fo]
    y = beta * h2 + one_m_beta * r + bias_mix

    o_ref[...] = jnp.tanh(alpha * y).astype(o_ref.dtype)


# --------------------------------------------------------------------------- wrapper
def pack_params(params, weight_dtype=jnp.float32):
    """Pad feature dims to multiples of 128, fuse W1|Wr, and pack biases/scalars."""
    w1, w2, wr = params["w1"], params["w2"], params["wr"]
    b1, b2, br = params["b1"], params["b2"], params["br"]
    f_in, f_out = w1.shape
    f_in_p = _round_up(f_in, LANE)
    f_out_p = _round_up(f_out, LANE)

    def pad2(a, rows, cols):
        return jnp.pad(a, ((0, rows - a.shape[0]), (0, cols - a.shape[1])))

    w1r = jnp.concatenate(
        [pad2(w1, f_in_p, f_out_p), pad2(wr, f_in_p, f_out_p)], axis=1
    ).astype(weight_dtype)
    w2_p = pad2(w2, f_out_p, f_out_p).astype(weight_dtype)

    # Layout: [ b1 | br | b2 ]  (matches kernel slicing).
    bias = jnp.concatenate(
        [pad2(b1, 1, f_out_p), pad2(br, 1, f_out_p), pad2(b2, 1, f_out_p)], axis=1
    ).astype(jnp.float32)

    scalars = jnp.concatenate(
        [params["alpha"], params["beta"]]).astype(jnp.float32)

    return {"scalars": scalars, "w1r": w1r, "w2": w2_p, "bias": bias,
            "f_in": f_in, "f_out": f_out, "f_in_p": f_in_p, "f_out_p": f_out_p,
            "compute_dtype": weight_dtype}


def residual_block_forward(x, packed, *, block_b=256):
    """x: (B, input_size) float32. packed: output of pack_params()."""
    b, f_in = x.shape
    assert f_in == packed["f_in"]
    f_in_p, f_out_p, f_out = packed["f_in_p"], packed["f_out_p"], packed["f_out"]

    # Batch tile: multiple of the 8-sublane granule, no larger than needed.
    tb = max(SUBLANE,
             min(_round_up(block_b, SUBLANE), _round_up(b, SUBLANE)))
    b_p = _round_up(b, tb)
    grid = (b_p // tb,)

    x_p = jnp.pad(x, ((0, b_p - b), (0, f_in_p - f_in))).astype(packed["compute_dtype"])

    # Rough VMEM budget: double-buffered x/out tiles + resident weights/bias + temps,
    # with margin; capped at 64 MiB so it is valid on v7x (64 MiB physical per TC).
    itemsize = jnp.dtype(packed["compute_dtype"]).itemsize
    est = (2 * tb * (f_in_p + f_out_p) * 4
           + (f_in_p * 2 * f_out_p + f_out_p * f_out_p) * itemsize
           + 3 * f_out_p * 4
           + 4 * tb * f_out_p * 4)
    vmem_limit = int(min(64 * 2 ** 20, max(16 * 2 ** 20, 4 * est)))

    out_p = pl.pallas_call(
        residual_block_kernel,
        out_shape=jax.ShapeDtypeStruct((b_p, f_out_p), jnp.float32),
        grid=grid,
        in_specs=[
            pl.BlockSpec(memory_space=pltpu.MemorySpace.SMEM),        # (alpha, beta)
            pl.BlockSpec((tb, f_in_p), lambda i: (i, 0)),             # x tile
            pl.BlockSpec((f_in_p, 2 * f_out_p), lambda i: (0, 0)),    # fused W1|Wr (resident)
            pl.BlockSpec((f_out_p, f_out_p), lambda i: (0, 0)),       # W2 (resident)
            pl.BlockSpec((1, 3 * f_out_p), lambda i: (0, 0)),         # packed biases (resident)
        ],
        out_specs=pl.BlockSpec((tb, f_out_p), lambda i: (i, 0)),
        compiler_params=pltpu.CompilerParams(
            dimension_semantics=("parallel",),
            vmem_limit_bytes=vmem_limit),
    )(packed["scalars"], x_p, packed["w1r"], packed["w2"], packed["bias"])

    return out_p[:b, :f_out]


# --------------------------------------------------------------------------- init / reference
def xavier_uniform(key, fan_in, fan_out):
    limit = jnp.sqrt(6.0 / (fan_in + fan_out))
    return jax.random.uniform(key, (fan_in, fan_out), jnp.float32, -limit, limit)


def linear_bias_init(key, fan_in, fan_out):
    bound = 1.0 / jnp.sqrt(jnp.asarray(fan_in, jnp.float32))
    return jax.random.uniform(key, (1, fan_out), jnp.float32, -bound, bound)


def init_params(key, input_size, output_size):
    k1, k2, k3, k4, k5, k6 = jax.random.split(key, 6)
    return {
        "alpha": jnp.array([0.9], dtype=jnp.float32),   # AdaptiveActivation.alpha
        "beta":  jnp.array([0.9], dtype=jnp.float32),   # ResidualBlock.beta
        "w1": xavier_uniform(k1, input_size, output_size),
        "b1": linear_bias_init(k2, input_size, output_size),
        "w2": xavier_uniform(k3, output_size, output_size),
        "b2": linear_bias_init(k4, output_size, output_size),
        "wr": xavier_uniform(k5, input_size, output_size),
        "br": linear_bias_init(k6, input_size, output_size),
    }


def residual_block_reference(x, p):
    alpha = p["alpha"][0]
    beta = jnp.clip(p["beta"][0], 0.01, 1.0)
    h = jnp.tanh(alpha * (x @ p["w1"] + p["b1"]))
    h = h @ p["w2"] + p["b2"]
    r = x @ p["wr"] + p["br"]
    return jnp.tanh(alpha * (beta * h + (1.0 - beta) * r))


# --------------------------------------------------------------------------- main
if __name__ == "__main__":
    batch, input_size, output_size = 8, 32, 32

    key = jax.random.PRNGKey(0)
    kx, kp, kx2 = jax.random.split(key, 3)
    x = jax.random.normal(kx, (batch, input_size), dtype=jnp.float32)
    params = init_params(kp, input_size, output_size)
    packed = pack_params(params)  # f32; pass weight_dtype=jnp.bfloat16 for v6e/v7x MXU rate

    out = residual_block_forward(x, packed)
    out = jax.block_until_ready(out)
    ref = residual_block_reference(x, params)
    assert out.shape == (batch, output_size)
    assert jnp.allclose(out, ref, atol=1e-5, rtol=1e-5)

    # Exercise the batch grid (several tiles, padded batch).
    x2 = jax.random.normal(kx2, (48, input_size), dtype=jnp.float32)
    out2 = jax.block_until_ready(residual_block_forward(x2, packed, block_b=16))
    ref2 = residual_block_reference(x2, params)
    assert out2.shape == (48, output_size)
    assert jnp.allclose(out2, ref2, atol=1e-5, rtol=1e-5)

    print("KERNEL_OK")
</pallas_src>

<mosaic_0001>
module attributes {stable_mosaic.version = 11 : i64} {
  func.func @residual_block_kernel(%arg0: i32, %arg1: memref<2xf32, #tpu.memory_space<smem>>, %arg2: memref<8x128xf32, #tpu.memory_space<vmem>>, %arg3: memref<128x256xf32, #tpu.memory_space<vmem>>, %arg4: memref<128x128xf32, #tpu.memory_space<vmem>>, %arg5: memref<1x384xf32, #tpu.memory_space<vmem>>, %arg6: memref<8x128xf32, #tpu.memory_space<vmem>>) attributes {dimension_semantics = [#tpu.dimension_semantics<parallel>], iteration_bounds = array<i64: 1>, scalar_prefetch = 0 : i64, scratch_operands = 0 : i64, tpu.core_type = #tpu.core_type<tc>, window_params = [{transform_indices = @transform_0, window_bounds = array<i64: 2>}, {transform_indices = @transform_1, window_bounds = array<i64: 8, 128>}, {pipeline_mode = #tpu.pipeline_mode<synchronous>, transform_indices = @transform_2, window_bounds = array<i64: 128, 256>}, {pipeline_mode = #tpu.pipeline_mode<synchronous>, transform_indices = @transform_3, window_bounds = array<i64: 128, 128>}, {pipeline_mode = #tpu.pipeline_mode<synchronous>, transform_indices = @transform_4, window_bounds = array<i64: 1, 384>}, {transform_indices = @transform_5, window_bounds = array<i64: 8, 128>}]} {
    %c0 = arith.constant 0 : index
    %0 = memref.load %arg1[%c0] : memref<2xf32, #tpu.memory_space<smem>>
    %c1 = arith.constant 1 : index
    %1 = memref.load %arg1[%c1] : memref<2xf32, #tpu.memory_space<smem>>
    %cst = arith.constant 0.00999999977 : f32
    %cst_0 = arith.constant 1.000000e+00 : f32
    %2 = arith.maximumf %cst, %1 : f32
    %3 = arith.minimumf %cst_0, %2 : f32
    %cst_1 = arith.constant 1.000000e+00 : f32
    %4 = arith.subf %cst_1, %3 : f32
    %c0_2 = arith.constant 0 : index
    %c0_3 = arith.constant 0 : index
    %5 = vector.load %arg2[%c0_2, %c0_3] : memref<8x128xf32, #tpu.memory_space<vmem>>, vector<8x128xf32>
    %c0_4 = arith.constant 0 : index
    %c0_5 = arith.constant 0 : index
    %6 = vector.load %arg3[%c0_4, %c0_5] : memref<128x256xf32, #tpu.memory_space<vmem>>, vector<128x256xf32>
    %cst_6 = arith.constant dense<0.000000e+00> : vector<8x256xf32>
    %7 = tpu.matmul %5, %6, %cst_6 {dimension_numbers = #tpu.dot_dimension_numbers<[1], [0], [0], [1], [0, 0, 1, 1], [], []>} : vector<8x128xf32>, vector<128x256xf32>, vector<8x256xf32> -> vector<8x256xf32>
    %8 = vector.extract_strided_slice %7 {offsets = [0, 0], sizes = [8, 128], strides = [1, 1]} : vector<8x256xf32> to vector<8x128xf32>
    %c0_7 = arith.constant 0 : index
    %c0_8 = arith.constant 0 : index
    %9 = vector.load %arg5[%c0_7, %c0_8] : memref<1x384xf32, #tpu.memory_space<vmem>>, vector<1x128xf32>
    %10 = vector.broadcast %9 : vector<1x128xf32> to vector<8x128xf32>
    %11 = arith.addf %8, %10 : vector<8x128xf32>
    %12 = vector.broadcast %0 : f32 to vector<8x128xf32>
    %13 = arith.mulf %12, %11 : vector<8x128xf32>
    %14 = math.tanh %13 : vector<8x128xf32>
    %c0_9 = arith.constant 0 : index
    %c0_10 = arith.constant 0 : index
    %15 = vector.load %arg4[%c0_9, %c0_10] : memref<128x128xf32, #tpu.memory_space<vmem>>, vector<128x128xf32>
    %cst_11 = arith.constant dense<0.000000e+00> : vector<8x128xf32>
    %16 = tpu.matmul %14, %15, %cst_11 {dimension_numbers = #tpu.dot_dimension_numbers<[1], [0], [0], [1], [0, 0, 1, 1], [], []>} : vector<8x128xf32>, vector<128x128xf32>, vector<8x128xf32> -> vector<8x128xf32>
    %17 = vector.extract_strided_slice %7 {offsets = [0, 128], sizes = [8, 128], strides = [1, 1]} : vector<8x256xf32> to vector<8x128xf32>
    %c0_12 = arith.constant 0 : index
    %c256 = arith.constant 256 : index
    %18 = vector.load %arg5[%c0_12, %c256] : memref<1x384xf32, #tpu.memory_space<vmem>>, vector<1x128xf32>
    %19 = vector.broadcast %3 : f32 to vector<1x128xf32>
    %20 = arith.mulf %19, %18 : vector<1x128xf32>
    %c0_13 = arith.constant 0 : index
    %c128 = arith.constant 128 : index
    %21 = vector.load %arg5[%c0_13, %c128] : memref<1x384xf32, #tpu.memory_space<vmem>>, vector<1x128xf32>
    %22 = vector.broadcast %4 : f32 to vector<1x128xf32>
    %23 = arith.mulf %22, %21 : vector<1x128xf32>
    %24 = arith.addf %20, %23 : vector<1x128xf32>
    %25 = vector.broadcast %3 : f32 to vector<8x128xf32>
    %26 = arith.mulf %25, %16 : vector<8x128xf32>
    %27 = vector.broadcast %4 : f32 to vector<8x128xf32>
    %28 = arith.mulf %27, %17 : vector<8x128xf32>
    %29 = arith.addf %26, %28 : vector<8x128xf32>
    %30 = vector.broadcast %24 : vector<1x128xf32> to vector<8x128xf32>
    %31 = arith.addf %29, %30 : vector<8x128xf32>
    %32 = vector.broadcast %0 : f32 to vector<8x128xf32>
    %33 = arith.mulf %32, %31 : vector<8x128xf32>
    %34 = math.tanh %33 : vector<8x128xf32>
    %c0_14 = arith.constant 0 : index
    %c0_15 = arith.constant 0 : index
    %35 = vector.load %arg6[%c0_14, %c0_15] : memref<8x128xf32, #tpu.memory_space<vmem>>, vector<8x128xf32>
    tpu.vector_store %arg6[%c0_14, %c0_15], %34 {strides = array<i32>} : memref<8x128xf32, #tpu.memory_space<vmem>>, vector<8x128xf32>,
    return
  }
  func.func @transform_0(%arg0: i32) -> i32 {
    %c0_i32 = arith.constant 0 : i32
    %c0_i32_0 = arith.constant 0 : i32
    return %c0_i32 : i32
  }
  func.func @transform_1(%arg0: i32) -> (i32, i32) {
    %c0_i32 = arith.constant 0 : i32
    %c0_i32_0 = arith.constant 0 : i32
    return %arg0, %c0_i32 : i32, i32
  }
  func.func @transform_2(%arg0: i32) -> (i32, i32) {
    %c0_i32 = arith.constant 0 : i32
    %c0_i32_0 = arith.constant 0 : i32
    %c0_i32_1 = arith.constant 0 : i32
    return %c0_i32, %c0_i32_0 : i32, i32
  }
  func.func @transform_3(%arg0: i32) -> (i32, i32) {
    %c0_i32 = arith.constant 0 : i32
    %c0_i32_0 = arith.constant 0 : i32
    %c0_i32_1 = arith.constant 0 : i32
    return %c0_i32, %c0_i32_0 : i32, i32
  }
  func.func @transform_4(%arg0: i32) -> (i32, i32) {
    %c0_i32 = arith.constant 0 : i32
    %c0_i32_0 = arith.constant 0 : i32
    %c0_i32_1 = arith.constant 0 : i32
    return %c0_i32, %c0_i32_0 : i32, i32
  }
  func.func @transform_5(%arg0: i32) -> (i32, i32) {
    %c0_i32 = arith.constant 0 : i32
    %c0_i32_0 = arith.constant 0 : i32
    return %arg0, %c0_i32 : i32, i32
  }
}

</mosaic_0001>

<bundles_post_ra>
// kernel: tpu_custom_call.1
= control target key start
LH: loop header
LB: loop body
LE: loop exit
PB: predicated region body
PF: predicated region fallthrough
CT: control target
= control target key end

     0   :  { %10 = vsyncpa [#allocation5], 0  ;;  %s435_s0 = inlined_call_operand.hbm [shape: f32[2], index: 0, kind: input, shape index: {}]   ;;  %s436_s1 = inlined_call_operand.hbm [shape: f32[8,128], index: 1, kind: input, shape index: {}]   ;;  %s437_s2 = inlined_call_operand.hbm [shape: f32[128,256], index: 2, kind: input, shape index: {}]   ;;  %s438_s3 = inlined_call_operand.hbm [shape: f32[128,128], index: 3, kind: input, shape index: {}]   ;;  %s439_s4 = inlined_call_operand.vmem [shape: f32[1,384], index: 4, kind: input, shape index: {}]   ;;  %s440_s5 = inlined_call_operand.hbm [shape: f32[8,128], index: 5, kind: output, shape index: {}]  }
   0x1   :  { %11 = vsyncpa [#allocation3], 0 }
   0x2   :  { %12 = vsyncpa [#allocation8], 0  ;;  %s38_s20 = sshll.u32 %s437_s2, 4  ;;  %s39_s20 = int_to_ptr.hbm [resolvable:$true] %s38_s20 }
   0x3   :  { %13 = vsyncpa [#allocation4], 0  ;;  %s370_s21 = smov [#allocation7]   ;;  %s19_s25 = sshll.u32 %s435_s0, 4  ;;  %s20_s25 = int_to_ptr.hbm [resolvable:$true] %s19_s25 }
   0x4   :  { %s40_s22 = sshll.u32 %s370_s21, 4  ;;  %s371_s26 = smov 256   ;;  %s41_s22 = int_to_ptr.vmem [resolvable:$true] %s40_s22 }
   0x5   :  { %s372_s27 = smov 16   ;;  %s373_s28 = smov [#allocation2]  }
   0x6   :  { %46 = dma.hbm_to_vmem [thread:$0]  %s39_s20, 4096, %s41_s22, [#allocation8], %s371_s26, %s371_s26, %s372_s27  }
   0x7   :  { %22 = dma.hbm_to_smem %s20_s25, 16, %s373_s28, [#allocation5]  }
   0x8   :  { %s28_s6 = sshll.u32 %s436_s1, 4  ;;  %s374_s2 = smov [#allocation6]   ;;  %s29_s6 = int_to_ptr.hbm [resolvable:$true] %s28_s6 }
   0x9   :  { %s30_s7 = sshll.u32 %s374_s2, 4  ;;  %s51_s10 = sshll.u32 %s438_s3, 4  ;;  %s31_s7 = int_to_ptr.vmem [resolvable:$true] %s30_s7  ;;  %s52_s10 = int_to_ptr.hbm [resolvable:$true] %s51_s10 }
   0xa   :  { %33 = dma.hbm_to_vmem [thread:$0]  %s29_s6, 128, %s31_s7, [#allocation3]  }
   0xb   :  { %s375_s0 = smov [#allocation9]   ;;  %s376_s12 = smov 128  }
   0xc   :  { %s53_s11 = sshll.u32 %s375_s0, 4  ;;  %s377_s13 = smov 8   ;;  %s54_s11 = int_to_ptr.vmem [resolvable:$true] %s53_s11 }
   0xd   :  { %59 = dma.hbm_to_vmem [thread:$0]  %s52_s10, 2048, %s54_s11, [#allocation8], %s376_s12, %s376_s12, %s377_s13  }
   0xe   :  { %362 = dma.done.wait [#allocation5], 16  }
   0xf   :  { %363 = vsyncadd [#allocation5], 4294967280 }
  0x10   :  { %364 = dma.done.wait [#allocation3], 128  }
  0x11   :  { %365 = vsyncadd [#allocation3], 4294967168 }
  0x12   :  { %366 = dma.done.wait [#allocation8], 6144  }
  0x13   :  { %367 = vsyncadd [#allocation8], 4294961152 }
  0x14   :  { %78 = sfence }
  0x15   :  { %v115_v0 = vld [vmem:[#allocation7 + $0xf0] sm:$0xff]  ;;  %v113_v1 = vld [vmem:[#allocation7 + $0xe0] sm:$0xff]  ;;  %v180_v4 = vld [vmem:[#allocation9 + $0x78] sm:$0xff]  ;;  %s79_s1 = sld [smem:[#allocation2]]  ;;  %s378_s16 = smov 0.01  }
  0x16   :  { %117 = vmatpush.msra.mxu0 %v115_v0  ;;  %v111_v2 = vld [vmem:[#allocation7 + $0xd0] sm:$0xff]  ;;  %v109_v3 = vld [vmem:[#allocation7 + $0xc0] sm:$0xff]  ;;  %181 = vmatpush.msra.mxu2 %v180_v4  ;;  %v116_v7 = vld [vmem:[#allocation7 + $0xf8] sm:$0xff]  ;;  %s237_s15 = sld [smem:[#allocation2 + $0x1]]  ;;  %s379_s18 = smov 1.0  }
  0x17   :  { %v107_v5 = vld [vmem:[#allocation7 + $0xb0] sm:$0xff]  ;;  %v178_v8 = vld [vmem:[#allocation9 + $0x68] sm:$0xff]  ;;  %137 = vmatpush.msra.mxu1 %v116_v7  ;;  %v105_v10 = vld [vmem:[#allocation7 + $0xa0] sm:$0xff]  ;;  %s380_s25 = smov [#allocation10]   ;;  %s225_s29 = sshll.u32 %s440_s5, 4  ;;  %s226_s29 = int_to_ptr.hbm [resolvable:$true] %s225_s29 }
  0x18   :  { %118 = vmatpush.msra.mxu0 %v113_v1  ;;  %v179_v6 = vld [vmem:[#allocation9 + $0x70] sm:$0xff]  ;;  %v114_v9 = vld [vmem:[#allocation7 + $0xe8] sm:$0xff]  ;;  %v112_v11 = vld [vmem:[#allocation7 + $0xd8] sm:$0xff]  ;;  %s223_s26 = sshll.u32 %s380_s25, 4  ;;  %s224_s26 = int_to_ptr.vmem [resolvable:$true] %s223_s26 }
  0x19   :  { %182 = vmatpush.msra.mxu2 %v179_v6  ;;  %v177_v12 = vld [vmem:[#allocation9 + $0x60] sm:$0xff]  ;;  %138 = vmatpush.msra.mxu1 %v114_v9  ;;  %v103_v13 = vld [vmem:[#allocation7 + $0x90] sm:$0xff]  ;;  %v110_v14 = vld [vmem:[#allocation7 + $0xc8] sm:$0xff] }
  0x1a   :  { %119 = vmatpush.msra.mxu0 %v111_v2  ;;  %v176_v15 = vld [vmem:[#allocation9 + $0x58] sm:$0xff]  ;;  %v101_v16 = vld [vmem:[#allocation7 + $0x80] sm:$0xff]  ;;  %v175_v18 = vld [vmem:[#allocation9 + $0x50] sm:$0xff] }
  0x1b   :  { %183 = vmatpush.msra.mxu2 %v178_v8  ;;  %139 = vmatpush.msra.mxu1 %v112_v11  ;;  %v108_v17 = vld [vmem:[#allocation7 + $0xb8] sm:$0xff]  ;;  %v99_v19 = vld [vmem:[#allocation7 + $0x70] sm:$0xff]  ;;  %v106_v20 = vld [vmem:[#allocation7 + $0xa8] sm:$0xff]  ;;  %v162_v51 = vstv %s79_s1 }
  0x1c   :  { %120 = vmatpush.msra.mxu0 %v109_v3  ;;  %v174_v21 = vld [vmem:[#allocation9 + $0x48] sm:$0xff]  ;;  %v97_v22 = vld [vmem:[#allocation7 + $0x60] sm:$0xff]  ;;  %v104_v23 = vld [vmem:[#allocation7 + $0x98] sm:$0xff]  ;;  %s81_s17 = smax.f32 %s378_s16, %s237_s15 }
  0x1d   :  { %184 = vmatpush.msra.mxu2 %v177_v12  ;;  %140 = vmatpush.msra.mxu1 %v110_v14  ;;  %v173_v24 = vld [vmem:[#allocation9 + $0x40] sm:$0xff]  ;;  %v95_v25 = vld [vmem:[#allocation7 + $0x50] sm:$0xff]  ;;  %v172_v26 = vld [vmem:[#allocation9 + $0x38] sm:$0xff]  ;;  %s82_s19 = smin.f32 %s379_s18, %s81_s17 }
  0x1e   :  { %121 = vmatpush.msra.mxu0 %v107_v5  ;;  %v93_v27 = vld [vmem:[#allocation7 + $0x40] sm:$0xff]  ;;  %v171_v28 = vld [vmem:[#allocation9 + $0x30] sm:$0xff]  ;;  %v84_v33 = vld [vmem:[#allocation6] sm:$0xff]  ;;  %s83_s20 = ssub.f32 1.0, %s82_s19  ;;  %v202_v58 = vstv %s82_s19 }
  0x1f   :  { %185 = vmatpush.msra.mxu2 %v176_v15  ;;  %141 = vmatpush.msra.mxu1 %v108_v17  ;;  %v91_v29 = vld [vmem:[#allocation7 + $0x30] sm:$0xff]  ;;  %v89_v30 = vld [vmem:[#allocation7 + $0x20] sm:$0xff]  ;;  %v102_v34 = vld [vmem:[#allocation7 + $0x88] sm:$0xff] }
  0x20   :  { %122 = vmatpush.msra.mxu0 %v105_v10  ;;  %v87_v31 = vld [vmem:[#allocation7 + $0x10] sm:$0xff]  ;;  %v85_v32 = vld [vmem:[#allocation7] sm:$0xff]  ;;  %v170_v35 = vld [vmem:[#allocation9 + $0x28] sm:$0xff]  ;;  %v205_v56 = vstv %s83_s20 }
  0x21   :  { %186 = vmatpush.msra.mxu2 %v175_v18  ;;  %142 = vmatpush.msra.mxu1 %v106_v20  ;;  %v100_v36 = vld [vmem:[#allocation7 + $0x78] sm:$0xff]  ;;  %v169_v37 = vld [vmem:[#allocation9 + $0x20] sm:$0xff]  ;;  %v98_v38 = vld [vmem:[#allocation7 + $0x68] sm:$0xff] }
  0x22   :  { %123 = vmatpush.msra.mxu0 %v103_v13  ;;  %v168_v39 = vld [vmem:[#allocation9 + $0x18] sm:$0xff]  ;;  %v167_v41 = vld [vmem:[#allocation9 + $0x10] sm:$0xff]  ;;  %v94_v42 = vld [vmem:[#allocation7 + $0x48] sm:$0xff] }
  0x23   :  { %187 = vmatpush.msra.mxu2 %v174_v21  ;;  %143 = vmatpush.msra.mxu1 %v104_v23  ;;  %v96_v40 = vld [vmem:[#allocation7 + $0x58] sm:$0xff]  ;;  %v166_v43 = vld [vmem:[#allocation9 + $0x8] sm:$0xff]  ;;  %v165_v45 = vld [vmem:[#allocation9] sm:$0xff] }
  0x24   :  { %124 = vmatpush.msra.mxu0 %v101_v16  ;;  %v92_v44 = vld [vmem:[#allocation7 + $0x38] sm:$0xff]  ;;  %v90_v46 = vld [vmem:[#allocation7 + $0x28] sm:$0xff]  ;;  %v249_v49 = vld [vmem:[%s439_s4] ss:$0 sm:$0xff] }
  0x25   :  { %188 = vmatpush.msra.mxu2 %v173_v24  ;;  %144 = vmatpush.msra.mxu1 %v102_v34  ;;  %v88_v47 = vld [vmem:[#allocation7 + $0x18] sm:$0xff]  ;;  %v86_v48 = vld [vmem:[#allocation7 + $0x8] sm:$0xff]  ;;  %v204_v55 = vld [vmem:[%s439_s4 + $0x1] sm:$0x1] }
  0x26   :  { %125 = vmatpush.msra.mxu0 %v99_v19  ;;  %v201_v57 = vld [vmem:[%s439_s4 + $0x2] sm:$0x1]  ;;  %v206_v59 = vmul.f32 %v205_v56, %v204_v55 }
  0x27   :  { %189 = vmatpush.msra.mxu2 %v172_v26  ;;  %145 = vmatpush.msra.mxu1 %v100_v36  ;;  %v203_v60 = vmul.f32 %v202_v58, %v201_v57 }
  0x28   :  { %126 = vmatpush.msra.mxu0 %v97_v22 }
  0x29   :  { %190 = vmatpush.msra.mxu2 %v171_v28  ;;  %146 = vmatpush.msra.mxu1 %v98_v38  ;;  %v207_v62 = vadd.f32 %v206_v59, %v203_v60 }
  0x2a   :  { %127 = vmatpush.msra.mxu0 %v95_v25 }
  0x2b   :  { %191 = vmatpush.msra.mxu2 %v170_v35  ;;  %147 = vmatpush.msra.mxu1 %v96_v40  ;;  %v212_v2 = vperm.slane %v207_v62, 0 }
  0x2c   :  { %128 = vmatpush.msra.mxu0 %v93_v27 }
  0x2d   :  { %192 = vmatpush.msra.mxu2 %v169_v37  ;;  %148 = vmatpush.msra.mxu1 %v94_v42 }
  0x2e   :  { %129 = vmatpush.msra.mxu0 %v91_v29 }
  0x2f   :  { %193 = vmatpush.msra.mxu2 %v168_v39  ;;  %149 = vmatpush.msra.mxu1 %v92_v44 }
  0x30   :  { %130 = vmatpush.msra.mxu0 %v89_v30 }
  0x31   :  { %194 = vmatpush.msra.mxu2 %v167_v41  ;;  %150 = vmatpush.msra.mxu1 %v90_v46 }
  0x32   :  { %131 = vmatpush.msra.mxu0 %v87_v31 }
  0x33   :  { %195 = vmatpush.msra.mxu2 %v166_v43  ;;  %151 = vmatpush.msra.mxu1 %v88_v47 }
  0x34   :  { %132 = vmatpush.msra.mxu0 %v85_v32 }
  0x35   :  { %133 = vmatmul.f32.vlgmr.msra.gmra.mxu0 %v84_v33  ;;  %196 = vmatpush.msra.mxu2 %v165_v45 }
  0x36   :  { %152 = vmatpush.msra.mxu1 %v86_v48 }
  0x37   :  { %153 = vmatmul.f32.vlgmr.msra.gmra.mxu1 %v84_v33 }
  0xb2   :  { %v134_v50 = vpop.f32.mrf.mxu0 }
  0xb3   :  { %v161_v52 = vadd.f32 %v249_v49, %v134_v50 }
  0xb4   :  { %v154_v61 = vpop.f32.mrf.mxu1 }
  0xb5   :  { %v163_v53 = vmul.f32 %v162_v51, %v161_v52  ;;  %v209_v63 = vmul.f32 %v205_v56, %v154_v61 }
  0xb7   :  { %250 = vtanh.f32 %v163_v53 }
  0xbd   :  { %v251_v54 = vpop.eup %250 }
  0xbe   :  { %197 = vmatmul.f32.vlgmr.msra.gmra.mxu2 %v251_v54 }
 0x141   :  { %v198_v0 = vpop.f32.mrf.mxu2 }
 0x142   :  { %v208_v1 = vmul.f32 %v202_v58, %v198_v0 }
 0x144   :  { %v210_v3 = vadd.f32 %v209_v63, %v208_v1 }
 0x146   :  { %v214_v4 = vadd.f32 %v212_v2, %v210_v3 }
 0x148   :  { %v215_v5 = vmul.f32 %v214_v4, %v162_v51 }
 0x14a   :  { %252 = vtanh.f32 %v215_v5 }
 0x150   :  { %v253_v6 = vpop.eup %252 }
 0x151   :  { %217 = vst [vmem:[#allocation10] sm:$0xff] %v253_v6 }
 0x152   :  { %228 = dma.vmem_to_hbm [thread:$0]  %s224_s26, 128, %s226_s29, [#allocation4]  }
 0x153   :  { %368 = dma.done.wait [#allocation4], 128  }
 0x154   :  { %369 = vsyncadd [#allocation4], 4294967168 }
 0x155   :  { %233 = vsyncpa [#allocation3], 1 }
 0x156   :  { %234 = vsyncpa [#allocation8], 1 }
 0x157   :  { %235 = vsyncpa [#allocation4], 1 }
 0x158   :  { %236 = vsyncpa [#allocation5], 1 }

</bundles_post_ra>
